<compile_context>
chip_gen: v6e
topology: v6e:2x2x1
jax: 0.10.0
libtpu: 0.0.40
codegen_flags: <defaults>
</compile_context>

<pallas_src>
import jax
import jax.numpy as jnp
from jax.experimental import pallas as pl
from jax.experimental.pallas import tpu as pltpu


def _round_up(x: int, m: int) -> int:
    return ((x + m - 1) // m) * m


def _ae_kernel(x_ref, w1_ref, b1_ref, w2_ref, b2_ref, o_ref):
    # x tile streams through VMEM each grid step; weights/biases are resident
    # (constant (0, 0) index_maps).
    x = x_ref[...]                                   # [tile_n, in_dim], f32 or bf16
    xf = x.astype(jnp.float32)                       # no-op when x is already f32

    # Linear(in_dim -> 64) + ReLU (MXU matmul, f32 accumulate).
    h = jnp.dot(x, w1_ref[...], preferred_element_type=jnp.float32) + b1_ref[...]
    h = jnp.maximum(h, 0.0)                          # [tile_n, h_dim]

    # Dropout(p=0.2) is identity in eval mode.
    # TODO(synk): training-mode stochastic dropout not implemented.

    # Linear(64 -> in_dim).
    x_rec = jnp.dot(h, w2_ref[...], preferred_element_type=jnp.float32) + b2_ref[...]

    # Sum of squared reconstruction error along the feature axis; stored as a
    # (tile_n, 1) column (output bytes are tiny, so no lane-dense relayout).
    d = x_rec - xf                                   # [tile_n, in_dim] f32
    o_ref[...] = jnp.sum(d * d, axis=-1, keepdims=True)


def _choose_tile_n(n: int, in_dim: int, tile_n: int) -> int:
    """Pick a row-tile: multiple of 128 when possible, >= ~8 tiles for small
    batches (megacore + pipeline overlap), VMEM-safe on v7x, never exceeding
    the sublane-rounded batch."""
    t = min(tile_n, _round_up(pl.cdiv(n, 8), 128))
    t = _round_up(max(t, 128), 128)
    # VMEM gate: double-buffered x tile (lanes padded to 128) stays under ~16 MiB,
    # well inside v7x's 32 MiB default scoped limit.
    lane = _round_up(in_dim, 128)
    x_budget = 16 << 20
    vmem_cap = max(128, ((x_budget // (2 * lane * 4)) // 128) * 128)
    t = min(t, vmem_cap)
    # Never exceed the batch itself (keeps block <= array up to sublane rounding).
    t = min(t, _round_up(n, 8))
    return max(t, 8)


def autoencoder_forward(x, w1, b1, w2, b2, *, tile_n=2048):
    """x: [N, in_dim] (f32 or bf16) -> [N] f32 = sum((MLP(x) - x)^2, axis=-1)."""
    n, in_dim = x.shape
    h_dim = w1.shape[1]

    tile = _choose_tile_n(n, in_dim, tile_n)
    grid = pl.cdiv(n, tile)

    itemsize = jnp.dtype(x.dtype).itemsize
    weight_bytes = 4 * (w1.size + b1.size + w2.size + b2.size)
    cost = pl.CostEstimate(
        flops=4 * n * in_dim * h_dim,                      # two matmuls, 2 flops/MAC
        transcendentals=0,
        bytes_accessed=n * in_dim * itemsize + 4 * n + weight_bytes,
    )

    out = pl.pallas_call(
        _ae_kernel,
        out_shape=jax.ShapeDtypeStruct((n, 1), jnp.float32),
        grid=(grid,),
        in_specs=[
            pl.BlockSpec((tile, in_dim), lambda i: (i, 0)),   # x: streamed per tile
            pl.BlockSpec((in_dim, h_dim), lambda i: (0, 0)),  # W1: VMEM-resident
            pl.BlockSpec((1, h_dim), lambda i: (0, 0)),       # b1: VMEM-resident
            pl.BlockSpec((h_dim, in_dim), lambda i: (0, 0)),  # W2: VMEM-resident
            pl.BlockSpec((1, in_dim), lambda i: (0, 0)),      # b2: VMEM-resident
        ],
        out_specs=pl.BlockSpec((tile, 1), lambda i: (i, 0)),
        compiler_params=pltpu.CompilerParams(
            # Batch tiles are independent -> shard across v7x's 2 TensorCores;
            # harmless no-op on single-TC v5e/v6e.
            dimension_semantics=("parallel",),
        ),
        cost_estimate=cost,
    )(x, w1, b1, w2, b2)
    return out[:, 0]


def _reference(x, w1, b1, w2, b2):
    xf = x.astype(jnp.float32)
    h = jnp.maximum(xf @ w1 + b1, 0.0)
    x_rec = h @ w2 + b2
    return jnp.sum(jnp.square(x_rec - xf), axis=-1)


if __name__ == "__main__":
    # Small shapes consistent with the module: x is [N, in_dim], h_dim = 64.
    N, IN_DIM, H_DIM = 8, 16, 64

    key = jax.random.PRNGKey(0)
    kx, k1, k2, k3, k4, kx2 = jax.random.split(key, 6)

    # Deterministic parameter init (synthetic; mimics torch.nn.Linear uniform scale).
    bound1 = 1.0 / jnp.sqrt(IN_DIM)
    bound2 = 1.0 / jnp.sqrt(H_DIM)
    w1 = jax.random.uniform(k1, (IN_DIM, H_DIM), jnp.float32, -bound1, bound1)
    b1 = jax.random.uniform(k2, (1, H_DIM), jnp.float32, -bound1, bound1)
    w2 = jax.random.uniform(k3, (H_DIM, IN_DIM), jnp.float32, -bound2, bound2)
    b2 = jax.random.uniform(k4, (1, IN_DIM), jnp.float32, -bound2, bound2)

    # Case 1: tiny batch (single, sub-128 tile).
    x = jax.random.normal(kx, (N, IN_DIM), dtype=jnp.float32)
    out = jax.block_until_ready(autoencoder_forward(x, w1, b1, w2, b2))
    ref = _reference(x, w1, b1, w2, b2)
    assert out.shape == (N,)
    assert jnp.allclose(out, ref, atol=1e-3, rtol=1e-3), (out, ref)

    # Case 2: multi-tile batch exercising the grid, ragged last block (no pad),
    # weight residency and the "parallel" batch axis.
    N2 = 300
    x2 = jax.random.normal(kx2, (N2, IN_DIM), dtype=jnp.float32)
    out2 = jax.block_until_ready(autoencoder_forward(x2, w1, b1, w2, b2))
    ref2 = _reference(x2, w1, b1, w2, b2)
    assert out2.shape == (N2,)
    assert jnp.allclose(out2, ref2, atol=1e-3, rtol=1e-3), (out2, ref2)

    # Case 3: bf16 activations (halves HBM traffic for x); math stays f32.
    x3 = x2.astype(jnp.bfloat16)
    out3 = jax.block_until_ready(autoencoder_forward(x3, w1, b1, w2, b2))
    ref3 = _reference(x3, w1, b1, w2, b2)
    assert out3.shape == (N2,)
    assert jnp.allclose(out3, ref3, atol=1e-2, rtol=1e-2), (out3, ref3)

    print("KERNEL_OK")
</pallas_src>

<mosaic_0001>
module attributes {stable_mosaic.version = 11 : i64} {
  func.func @_ae_kernel(%arg0: i32, %arg1: memref<8x16xf32, #tpu.memory_space<vmem>>, %arg2: memref<16x64xf32, #tpu.memory_space<vmem>>, %arg3: memref<1x64xf32, #tpu.memory_space<vmem>>, %arg4: memref<64x16xf32, #tpu.memory_space<vmem>>, %arg5: memref<1x16xf32, #tpu.memory_space<vmem>>, %arg6: memref<8x1xf32, #tpu.memory_space<vmem>>) attributes {dimension_semantics = [#tpu.dimension_semantics<parallel>], iteration_bounds = array<i64: 1>, scalar_prefetch = 0 : i64, scratch_operands = 0 : i64, tpu.core_type = #tpu.core_type<tc>, window_params = [{transform_indices = @transform_0, window_bounds = array<i64: 8, 16>}, {pipeline_mode = #tpu.pipeline_mode<synchronous>, transform_indices = @transform_1, window_bounds = array<i64: 16, 64>}, {pipeline_mode = #tpu.pipeline_mode<synchronous>, transform_indices = @transform_2, window_bounds = array<i64: 1, 64>}, {pipeline_mode = #tpu.pipeline_mode<synchronous>, transform_indices = @transform_3, window_bounds = array<i64: 64, 16>}, {pipeline_mode = #tpu.pipeline_mode<synchronous>, transform_indices = @transform_4, window_bounds = array<i64: 1, 16>}, {transform_indices = @transform_5, window_bounds = array<i64: 8, 1>}]} {
    %c0 = arith.constant 0 : index
    %c0_0 = arith.constant 0 : index
    %0 = vector.load %arg1[%c0, %c0_0] : memref<8x16xf32, #tpu.memory_space<vmem>>, vector<8x16xf32>
    %c0_1 = arith.constant 0 : index
    %c0_2 = arith.constant 0 : index
    %1 = vector.load %arg2[%c0_1, %c0_2] : memref<16x64xf32, #tpu.memory_space<vmem>>, vector<16x64xf32>
    %cst = arith.constant dense<0.000000e+00> : vector<8x64xf32>
    %2 = tpu.matmul %0, %1, %cst {dimension_numbers = #tpu.dot_dimension_numbers<[1], [0], [0], [1], [0, 0, 1, 1], [], []>} : vector<8x16xf32>, vector<16x64xf32>, vector<8x64xf32> -> vector<8x64xf32>
    %c0_3 = arith.constant 0 : index
    %c0_4 = arith.constant 0 : index
    %3 = vector.load %arg3[%c0_3, %c0_4] : memref<1x64xf32, #tpu.memory_space<vmem>>, vector<1x64xf32>
    %4 = vector.broadcast %3 : vector<1x64xf32> to vector<8x64xf32>
    %5 = arith.addf %2, %4 : vector<8x64xf32>
    %cst_5 = arith.constant 0.000000e+00 : f32
    %6 = vector.broadcast %cst_5 : f32 to vector<8x64xf32>
    %7 = arith.maximumf %5, %6 : vector<8x64xf32>
    %c0_6 = arith.constant 0 : index
    %c0_7 = arith.constant 0 : index
    %8 = vector.load %arg4[%c0_6, %c0_7] : memref<64x16xf32, #tpu.memory_space<vmem>>, vector<64x16xf32>
    %cst_8 = arith.constant dense<0.000000e+00> : vector<8x16xf32>
    %9 = tpu.matmul %7, %8, %cst_8 {dimension_numbers = #tpu.dot_dimension_numbers<[1], [0], [0], [1], [0, 0, 1, 1], [], []>} : vector<8x64xf32>, vector<64x16xf32>, vector<8x16xf32> -> vector<8x16xf32>
    %c0_9 = arith.constant 0 : index
    %c0_10 = arith.constant 0 : index
    %10 = vector.load %arg5[%c0_9, %c0_10] : memref<1x16xf32, #tpu.memory_space<vmem>>, vector<1x16xf32>
    %11 = vector.broadcast %10 : vector<1x16xf32> to vector<8x16xf32>
    %12 = arith.addf %9, %11 : vector<8x16xf32>
    %13 = arith.subf %12, %0 : vector<8x16xf32>
    %14 = arith.mulf %13, %13 : vector<8x16xf32>
    %cst_11 = arith.constant dense<0.000000e+00> : vector<8xf32>
    %15 = vector.multi_reduction <add>, %14, %cst_11 [1] : vector<8x16xf32> to vector<8xf32>
    %16 = vector.shape_cast %15 : vector<8xf32> to vector<8x1xf32>
    %c0_12 = arith.constant 0 : index
    %c0_13 = arith.constant 0 : index
    %17 = vector.load %arg6[%c0_12, %c0_13] : memref<8x1xf32, #tpu.memory_space<vmem>>, vector<8x1xf32>
    tpu.vector_store %arg6[%c0_12, %c0_13], %16 {strides = array<i32>} : memref<8x1xf32, #tpu.memory_space<vmem>>, vector<8x1xf32>,
    return
  }
  func.func @transform_0(%arg0: i32) -> (i32, i32) {
    %c0_i32 = arith.constant 0 : i32
    %c0_i32_0 = arith.constant 0 : i32
    return %arg0, %c0_i32 : i32, i32
  }
  func.func @transform_1(%arg0: i32) -> (i32, i32) {
    %c0_i32 = arith.constant 0 : i32
    %c0_i32_0 = arith.constant 0 : i32
    %c0_i32_1 = arith.constant 0 : i32
    return %c0_i32, %c0_i32_0 : i32, i32
  }
  func.func @transform_2(%arg0: i32) -> (i32, i32) {
    %c0_i32 = arith.constant 0 : i32
    %c0_i32_0 = arith.constant 0 : i32
    %c0_i32_1 = arith.constant 0 : i32
    return %c0_i32, %c0_i32_0 : i32, i32
  }
  func.func @transform_3(%arg0: i32) -> (i32, i32) {
    %c0_i32 = arith.constant 0 : i32
    %c0_i32_0 = arith.constant 0 : i32
    %c0_i32_1 = arith.constant 0 : i32
    return %c0_i32, %c0_i32_0 : i32, i32
  }
  func.func @transform_4(%arg0: i32) -> (i32, i32) {
    %c0_i32 = arith.constant 0 : i32
    %c0_i32_0 = arith.constant 0 : i32
    %c0_i32_1 = arith.constant 0 : i32
    return %c0_i32, %c0_i32_0 : i32, i32
  }
  func.func @transform_5(%arg0: i32) -> (i32, i32) {
    %c0_i32 = arith.constant 0 : i32
    %c0_i32_0 = arith.constant 0 : i32
    return %arg0, %c0_i32 : i32, i32
  }
}

</mosaic_0001>

<bundles_post_ra>
// kernel: tpu_custom_call.1
= control target key start
LH: loop header
LB: loop body
LE: loop exit
PB: predicated region body
PF: predicated region fallthrough
CT: control target
= control target key end

     0   :  { %v249_v0 = vmov 0.0   ;;  %vm250_vm0 = vmmov 0   ;;  %vm30_vm1 = vcmask 130048   ;;  %vm120_vm2 = vcmask 523264   ;;  %s327_s1 = inlined_call_operand.vmem [shape: f32[16,64], index: 1, kind: input, shape index: {}]   ;;  %s328_s0 = inlined_call_operand.vmem [shape: f32[8,16], index: 0, kind: input, shape index: {}]   ;;  %s329_s3 = inlined_call_operand.vmem [shape: f32[64,16], index: 3, kind: input, shape index: {}]   ;;  %s330_s2 = inlined_call_operand.vmem [shape: f32[1,64], index: 2, kind: input, shape index: {}]   ;;  %s331_s4 = inlined_call_operand.vmem [shape: f32[1,16], index: 4, kind: input, shape index: {}]   ;;  %s332_s5 = inlined_call_operand.vmem [shape: f32[8,1], index: 5, kind: output, shape index: {}]  }
   0x1   :  { %221 = vmatprep.subr.mxu0 %v249_v0  ;;  %v22_v1 = vld [vmem:[%s327_s1 + $0x8] sm:$0xff]  ;;  %v21_v2 = vld [vmem:[%s327_s1] sm:$0xff]  ;;  %225 = vmatprep.mubr.msk.f32.mxu0 %vm250_vm0, %v249_v0  ;;  %v112_v4 = vld [vmem:[%s329_s3 + $0x38] sm:$0xff]  ;;  %vm199_vm3 = vcmask 7168  }
   0x2   :  { %222 = vmatpush3.msra.mxu0 %v22_v1  ;;  %v20_v3 = vld [vmem:[%s328_s0] sm:$0xff]  ;;  %228 = vmatprep.subr.mxu1 %v249_v0  ;;  %v111_v5 = vld [vmem:[%s329_s3 + $0x30] sm:$0xff]  ;;  %v110_v6 = vld [vmem:[%s329_s3 + $0x28] sm:$0xff] }
   0x3   :  { %223 = vmatprep.subr.mxu0 %v249_v0  ;;  %229 = vmatpush3.msra.mxu1 %v112_v4  ;;  %v109_v7 = vld [vmem:[%s329_s3 + $0x20] sm:$0xff]  ;;  %v108_v8 = vld [vmem:[%s329_s3 + $0x18] sm:$0xff]  ;;  %v107_v9 = vld [vmem:[%s329_s3 + $0x10] sm:$0xff] }
   0x4   :  { %224 = vmatpush3.msra.mxu0 %v21_v2  ;;  %230 = vmatprep.subr.mxu1 %v249_v0  ;;  %v106_v10 = vld [vmem:[%s329_s3 + $0x8] sm:$0xff]  ;;  %v105_v11 = vld [vmem:[%s329_s3] sm:$0xff] }
   0x5   :  { %226 = vmatmul.mubr.msk.f32.vlgmr.msra.gmra.mxu0 %vm30_vm1, %v20_v3  ;;  %231 = vmatpush3.msra.mxu1 %v111_v5  ;;  %v205_v12 = vld [vmem:[%s330_s2] ss:$0 sm:$0xff] }
   0x6   :  { %232 = vmatprep.subr.mxu1 %v249_v0  ;;  %244 = vmatprep.mubr.msk.f32.mxu1 %vm250_vm0, %v249_v0  ;;  %v207_v17 = vld [vmem:[%s331_s4] ss:$0 sm:$0xff] }
   0x7   :  { %233 = vmatpush3.msra.mxu1 %v110_v6 }
   0x8   :  { %234 = vmatprep.subr.mxu1 %v249_v0 }
   0x9   :  { %235 = vmatpush3.msra.mxu1 %v109_v7 }
   0xa   :  { %236 = vmatprep.subr.mxu1 %v249_v0 }
   0xb   :  { %237 = vmatpush3.msra.mxu1 %v108_v8 }
   0xc   :  { %238 = vmatprep.subr.mxu1 %v249_v0 }
   0xd   :  { %239 = vmatpush3.msra.mxu1 %v107_v9 }
   0xe   :  { %240 = vmatprep.subr.mxu1 %v249_v0 }
   0xf   :  { %241 = vmatpush3.msra.mxu1 %v106_v10 }
  0x10   :  { %242 = vmatprep.subr.mxu1 %v249_v0 }
  0x11   :  { %243 = vmatpush3.msra.mxu1 %v105_v11 }
  0xc5   :  { %v100_v13 = vpop.f32.mrf.mxu0 }
  0xc6   :  { %v101_v14 = vadd.f32 %v205_v12, %v100_v13 }
  0xc7   :  { %v227_v15 = vpop.f32.mrf.mxu0 }
  0xc8   :  { %v104_v16 = vmax.f32 %v101_v14, 0.0 }
  0xca   :  { %245 = vmatmul.mubr.msk.f32.vlgmr.msra.gmra.mxu1 %vm120_vm2, %v104_v16 }
 0x18a   :  { %v190_v18 = vpop.f32.mrf.mxu1 }
 0x18b   :  { %v191_v19 = vadd.f32 %v207_v17, %v190_v18 }
 0x18c   :  { %v246_v20 = vpop.f32.mrf.mxu1 }
 0x18d   :  { %v194_v21 = vsub.f32 %v191_v19, %v20_v3 }
 0x18f   :  { %v195_v22 = vmul.f32 %v194_v21, %v194_v21 }
 0x191   :  { %v196_v23 = vsel %vm30_vm1, %v195_v22, 0.0 }
 0x192   :  { %197 = vadd.xlane.f32.xlu0 %v196_v23 }
 0x21b   :  { %v198_v24 = vpop.xlane.xlu0 %197 }
 0x21c   :  { %200 = vst.msk [vmem:[%s332_s5] sm:$0xff] %vm199_vm3, %v198_v24 }

</bundles_post_ra>
